<compile_context>
chip_gen: v7x
topology: tpu7x:2x2x1
jax: 0.10.0
libtpu: 0.0.40
codegen_flags: <defaults>
</compile_context>

<pallas_src>
import jax
import jax.numpy as jnp
from jax.experimental import pallas as pl
from jax.experimental.pallas import tpu as pltpu

LANE = 512  # lane-dense last dim (multiple of 128)


def _round_up(a, b):
    return ((a + b - 1) // b) * b


def nearest_mean_kernel(thr_ref, lab_ref, x_ref, o_ref):
    """Elementwise interval-bucketize: map each value to its nearest-mean class.

    thr_ref: SMEM (K-1,) float32 sorted thresholds (midpoints of sorted means)
    lab_ref: SMEM (K,)   int32   labels in mean-sorted order
    x_ref:   VMEM (row_tile, LANE) float32 tile of the flattened channel-0 input
    o_ref:   VMEM (row_tile, LANE) int32   tile of class predictions
    """
    x = x_ref[...]
    num_labels = lab_ref.shape[0]

    # Reverse select chain: start with the last label, then for thresholds from
    # largest to smallest overwrite where x < thr[i].  The final value is the
    # label of the *smallest* i with x < thr[i] (first-match, as in PyTorch);
    # NaN never satisfies '<' and keeps the last label.
    y = jnp.full(x.shape, lab_ref[num_labels - 1], dtype=jnp.int32)
    for i in range(num_labels - 2, -1, -1):
        y = jnp.where(x < thr_ref[i], lab_ref[i], y)

    o_ref[...] = y


def tumor_simple_baseline_forward(x, thresholds, labels):
    """x: (N, C, H, W) float. thresholds: (K-1,) f32. labels: (K,) i32.

    Returns (N, H, W) int32 class predictions for channel 0 of x.
    """
    N, C, H, W = x.shape
    x0 = x[:, 0].astype(jnp.float32)           # glue: channel select (NCHW -> NHW)
    total = N * H * W

    # --- lane-dense slab: pad flat length to rows * LANE, rows % row_tile == 0 ---
    rows_raw = pl.cdiv(total, LANE)
    # row_tile: multiple of 8, capped at 512 (~1 MiB f32 tile -> comfortable on
    # v7x VMEM even double-buffered for input + output).
    row_tile = min(512, _round_up(rows_raw, 8))
    rows = _round_up(rows_raw, row_tile)
    padded_total = rows * LANE

    x_flat = x0.reshape(-1)
    if padded_total != total:
        x_flat = jnp.pad(x_flat, (0, padded_total - total))   # padded tail discarded later
    x2d = x_flat.reshape(rows, LANE)

    out2d = pl.pallas_call(
        nearest_mean_kernel,
        out_shape=jax.ShapeDtypeStruct((rows, LANE), jnp.int32),
        grid_spec=pltpu.PrefetchScalarGridSpec(
            num_scalar_prefetch=2,                                  # thresholds, labels -> SMEM
            grid=(rows // row_tile,),
            in_specs=[pl.BlockSpec((row_tile, LANE), lambda i, thr, lab: (i, 0))],
            out_specs=pl.BlockSpec((row_tile, LANE), lambda i, thr, lab: (i, 0)),
        ),
        compiler_params=pltpu.CompilerParams(
            dimension_semantics=("parallel",)),
    )(thresholds, labels, x2d)

    return out2d.reshape(-1)[:total].reshape(N, H, W)


def build_nearest_mean_params(classes, X0_train, y_train):
    """Deterministic re-implementation of TumorSimpleBaseline.__init__ /
    NearestMean.__init__: per-class means -> sorted thresholds + labels.
    (The PyTorch dataloader mean-collection loop is init-time glue, done here
    in plain JAX.)"""
    Xf = X0_train.reshape(-1)
    yf = y_train.reshape(-1)
    means = []
    for c in classes:
        mask = (yf == c)
        m = jnp.sum(Xf * mask) / jnp.sum(mask)
        means.append(float(m))
    zipped = sorted(zip(means, classes))
    thresholds = [(zipped[i][0] + zipped[i + 1][0]) / 2.0
                  for i in range(len(zipped) - 1)]
    sorted_labels = [z[1] for z in zipped]
    return (jnp.array(thresholds, dtype=jnp.float32),
            jnp.array(sorted_labels, dtype=jnp.int32),
            thresholds, sorted_labels)


def reference_forward(x, thresholds_list, labels_list):
    """Pure-JAX reference mirroring the PyTorch code (for verification)."""
    X = x[:, 0]
    Xf = X.reshape(-1)
    y = jnp.full(Xf.shape, -1, dtype=jnp.int32)
    for i in range(len(labels_list) - 1):
        y = jnp.where((y == -1) & (Xf < thresholds_list[i]), labels_list[i], y)
    y = jnp.where(y == -1, labels_list[-1], y)
    return y.reshape(X.shape)


if __name__ == "__main__":
    key = jax.random.PRNGKey(0)
    k_noise, k_lab, k_in = jax.random.split(key, 3)

    # --- deterministic "dataloader" pass to compute per-class means (init-time glue) ---
    classes = [0, 1, 2, 3]
    y_train = jax.random.randint(k_lab, (8, 16, 16), 0, len(classes))
    noise = jax.random.uniform(k_noise, (8, 16, 16)) * 0.2
    X0_train = y_train.astype(jnp.float32) * 0.25 + noise   # class-dependent values
    thr_arr, lab_arr, thr_list, lab_list = build_nearest_mean_params(
        classes, X0_train, y_train)

    # --- forward input: NCHW, small shapes ---
    x = jax.random.uniform(k_in, (2, 4, 16, 16), dtype=jnp.float32) * 1.2

    out = tumor_simple_baseline_forward(x, thr_arr, lab_arr)
    out = jax.block_until_ready(out)

    ref = reference_forward(x, thr_list, lab_list)
    assert out.shape == (2, 16, 16)
    assert out.dtype == jnp.int32
    assert bool(jnp.all(out == ref)), "Pallas kernel disagrees with reference"

    print("KERNEL_OK")
</pallas_src>

<mosaic_0001>
module attributes {stable_mosaic.version = 11 : i64} {
  func.func @nearest_mean_kernel(%arg0: i32, %arg1: memref<3xf32, #tpu.memory_space<smem>>, %arg2: memref<4xi32, #tpu.memory_space<smem>>, %arg3: memref<8x512xf32, #tpu.memory_space<vmem>>, %arg4: memref<8x512xi32, #tpu.memory_space<vmem>>) attributes {dimension_semantics = [#tpu.dimension_semantics<parallel>], iteration_bounds = array<i64: 1>, scalar_prefetch = 2 : i64, scratch_operands = 0 : i64, tpu.core_type = #tpu.core_type<tc>, window_params = [{transform_indices = @transform_0, window_bounds = array<i64: 8, 512>}, {transform_indices = @transform_1, window_bounds = array<i64: 8, 512>}]} {
    %c0 = arith.constant 0 : index
    %c0_0 = arith.constant 0 : index
    %0 = vector.load %arg3[%c0, %c0_0] : memref<8x512xf32, #tpu.memory_space<vmem>>, vector<8x512xf32>
    %c3 = arith.constant 3 : index
    %1 = memref.load %arg2[%c3] : memref<4xi32, #tpu.memory_space<smem>>
    %2 = vector.broadcast %1 : i32 to vector<8x512xi32>
    %c2 = arith.constant 2 : index
    %3 = memref.load %arg1[%c2] : memref<3xf32, #tpu.memory_space<smem>>
    %4 = vector.broadcast %3 : f32 to vector<8x512xf32>
    %5 = arith.cmpf olt, %0, %4 : vector<8x512xf32>
    %c2_1 = arith.constant 2 : index
    %6 = memref.load %arg2[%c2_1] : memref<4xi32, #tpu.memory_space<smem>>
    %7 = vector.broadcast %6 : i32 to vector<8x512xi32>
    %8 = arith.select %5, %7, %2 : vector<8x512xi1>, vector<8x512xi32>
    %c1 = arith.constant 1 : index
    %9 = memref.load %arg1[%c1] : memref<3xf32, #tpu.memory_space<smem>>
    %10 = vector.broadcast %9 : f32 to vector<8x512xf32>
    %11 = arith.cmpf olt, %0, %10 : vector<8x512xf32>
    %c1_2 = arith.constant 1 : index
    %12 = memref.load %arg2[%c1_2] : memref<4xi32, #tpu.memory_space<smem>>
    %13 = vector.broadcast %12 : i32 to vector<8x512xi32>
    %14 = arith.select %11, %13, %8 : vector<8x512xi1>, vector<8x512xi32>
    %c0_3 = arith.constant 0 : index
    %15 = memref.load %arg1[%c0_3] : memref<3xf32, #tpu.memory_space<smem>>
    %16 = vector.broadcast %15 : f32 to vector<8x512xf32>
    %17 = arith.cmpf olt, %0, %16 : vector<8x512xf32>
    %c0_4 = arith.constant 0 : index
    %18 = memref.load %arg2[%c0_4] : memref<4xi32, #tpu.memory_space<smem>>
    %19 = vector.broadcast %18 : i32 to vector<8x512xi32>
    %20 = arith.select %17, %19, %14 : vector<8x512xi1>, vector<8x512xi32>
    %c0_5 = arith.constant 0 : index
    %c0_6 = arith.constant 0 : index
    %21 = vector.load %arg4[%c0_5, %c0_6] : memref<8x512xi32, #tpu.memory_space<vmem>>, vector<8x512xi32>
    tpu.vector_store %arg4[%c0_5, %c0_6], %20 {strides = array<i32>} : memref<8x512xi32, #tpu.memory_space<vmem>>, vector<8x512xi32>,
    return
  }
  func.func @transform_0(%arg0: i32, %arg1: memref<3xf32, #tpu.memory_space<smem>>, %arg2: memref<4xi32, #tpu.memory_space<smem>>) -> (i32, i32) {
    %c0_i32 = arith.constant 0 : i32
    %c0_i32_0 = arith.constant 0 : i32
    return %arg0, %c0_i32 : i32, i32
  }
  func.func @transform_1(%arg0: i32, %arg1: memref<3xf32, #tpu.memory_space<smem>>, %arg2: memref<4xi32, #tpu.memory_space<smem>>) -> (i32, i32) {
    %c0_i32 = arith.constant 0 : i32
    %c0_i32_0 = arith.constant 0 : i32
    return %arg0, %c0_i32 : i32, i32
  }
}

</mosaic_0001>

<bundles_post_ra>
// kernel: tpu_custom_call.1
= control target key start
LH: loop header
LB: loop body
LE: loop exit
PB: predicated region body
PF: predicated region fallthrough
CT: control target
= control target key end

     0   :  { %s236_s0 = inlined_call_operand.hbm [shape: f32[3], index: 0, kind: input, shape index: {}]   ;;  %s237_s2 = inlined_call_operand.hbm [shape: f32[8,512], index: 2, kind: input, shape index: {}]   ;;  %s238_s3 = inlined_call_operand.hbm [shape: s32[8,512], index: 3, kind: output, shape index: {}]   ;;  %s239_s1 = inlined_call_operand.vmem [shape: s32[4], index: 1, kind: input, shape index: {}]  }
   0x1   :  { %s101_s14 = scalar_lea.hbm %s236_s0, 16 }
   0x2   :  { %p102_p0 = scmp.ne.s32.totalorder %s236_s0, %s101_s14  ;;  %p105_p1 = scmp.lt.u32.totalorder %s101_s14, %s236_s0 }
   0x4   :  { %p107_p2 = pnand %p105_p1, %p102_p0 }
   0x6   :  { %110 = shalt.err (!%p107_p2)  }
   0x7   :  { %s173_s19 = smov [#allocation3]   ;;  %s10_s24 = sshll.u32 %s239_s1, 4  ;;  %s11_s24 = int_to_ptr.vmem [resolvable:$true] %s10_s24 }
   0x8   :  { %9 = dma.hbm_to_smem %s236_s0, 16, %s173_s19, [#allocation2] }
   0x9   :  { %s111_s25 = scalar_lea.vmem %s11_s24, 16  ;;  %p116_p4 = scmp.lt.s32.totalorder %s11_s24, %s11_s24 }
   0xa   :  { %p112_p3 = scmp.ne.s32.totalorder %s11_s24, %s111_s25  ;;  %p117_p5 = scmp.lt.s32.totalorder %s111_s25, %s111_s25 }
   0xc   :  { %p118_p6 = por %p117_p5, %p116_p4 }
   0xe   :  { %p119_p7 = pnand %p118_p6, %p112_p3 }
  0x10   :  { %122 = shalt.err (!%p119_p7)  }
  0x11   :  { %s174_s26 = smov [#allocation4]  }
  0x12   :  { %13 = dma.vmem_to_smem %s11_s24, 16, %s174_s26, [#allocation2] }
  0x13   :  { %167 = dma.done.wait [#allocation2], 32 }
  0x14   :  { %168 = vsyncadd [#allocation2], 4294967264 }
  0x15   :  { %15 = sfence }
  0x16   :  { %16 = vsyncpa [#allocation6], 0 }
  0x17   :  { %17 = vsyncpa [#allocation7], 0  ;;  %s175_s0 = smov [#allocation5]   ;;  %s123_s29 = scalar_lea.hbm %s237_s2, 512 }
  0x18   :  { %s24_s27 = sshll.u32 %s175_s0, 4  ;;  %p124_p8 = scmp.ne.s32.totalorder %s237_s2, %s123_s29  ;;  %s25_s27 = int_to_ptr.vmem [resolvable:$true] %s24_s27 }
  0x19   :  { %p127_p9 = scmp.lt.u32.totalorder %s123_s29, %s237_s2 }
  0x1b   :  { %p129_p10 = pnand %p127_p9, %p124_p8 }
  0x1d   :  { %132 = shalt.err (!%p129_p10)
}
  0x1e   :  { %s133_s7 = scalar_lea.vmem %s25_s27, 512  ;;  %p138_p12 = scmp.lt.s32.totalorder %s25_s27, %s25_s27 }
  0x1f   :  { %p134_p11 = scmp.ne.s32.totalorder %s25_s27, %s133_s7  ;;  %p139_p13 = scmp.lt.s32.totalorder %s133_s7, %s133_s7 }
  0x21   :  { %p140_p0 = por %p139_p13, %p138_p12 }
  0x23   :  { %p141_p1 = pnand %p140_p0, %p134_p11 }
  0x25   :  { %144 = shalt.err (!%p141_p1)
}
  0x26   :  { %27 = dma.hbm_to_vmem [thread:$0]  %s237_s2, 512, %s25_s27, [#allocation6]  }
  0x27   :  { %169 = dma.done.wait [#allocation6], 512  }
  0x28   :  { %170 = vsyncadd [#allocation6], 4294966784  ;;  %s92_s10 = sld [smem:[#allocation4 + $0x3]]  ;;  %s93_s11 = sld [smem:[#allocation3 + $0x2]]  ;;  %v31_v0 = vld [vmem:[#allocation5] sm:$0xff]  ;;  %v32_v3 = vld [vmem:[#allocation5 + $0x8] sm:$0xff] }
  0x29   :  { %s94_s12 = sld [smem:[#allocation4 + $0x2]]  ;;  %s95_s13 = sld [smem:[#allocation3 + $0x1]]  ;;  %v33_v6 = vld [vmem:[#allocation5 + $0x10] sm:$0xff]  ;;  %v34_v13 = vld [vmem:[#allocation5 + $0x18] sm:$0xff] }
  0x2a   :  { %s96_s14 = sld [smem:[#allocation4 + $0x1]]  ;;  %s61_s15 = sld [smem:[#allocation3]] }
  0x2b   :  { %s67_s16 = sld [smem:[#allocation4]]  ;;  %s176_s2 = smov [#allocation8]  }
  0x2c   :  { %s83_s17 = sshll.u32 %s176_s2, 4  ;;  %s84_s17 = int_to_ptr.vmem [resolvable:$true] %s83_s17 }
  0x2d   :  { %s145_s18 = scalar_lea.vmem %s84_s17, 512  ;;  %p150_p3 = scmp.lt.s32.totalorder %s84_s17, %s84_s17 }
  0x2e   :  { %v36_v1 = vstv %s92_s10  ;;  %v38_v2 = vstv %s93_s11  ;;  %p146_p2 = scmp.ne.s32.totalorder %s84_s17, %s145_s18  ;;  %p151_p4 = scmp.lt.s32.totalorder %s145_s18, %s145_s18 }
  0x2f   :  { %vm39_vm0 = vcmp.lt.f32.partialorder %v31_v0, %v38_v2  ;;  %v44_v4 = vstv %s94_s12  ;;  %v50_v5 = vstv %s95_s13  ;;  %vm40_vm1 = vcmp.lt.f32.partialorder %v32_v3, %v38_v2 }
  0x30   :  { %v45_v7 = vsel %vm39_vm0, %v44_v4, %v36_v1  ;;  %vm51_vm2 = vcmp.lt.f32.partialorder %v31_v0, %v50_v5  ;;  %v56_v8 = vstv %s96_s14  ;;  %v62_v9 = vstv %s61_s15  ;;  %p152_p5 = por %p151_p4, %p150_p3 }
  0x31   :  { %v57_v10 = vsel %vm51_vm2, %v56_v8, %v45_v7  ;;  %vm63_vm3 = vcmp.lt.f32.partialorder %v31_v0, %v62_v9  ;;  %v68_v11 = vstv %s67_s16  ;;  %v46_v12 = vsel %vm40_vm1, %v44_v4, %v36_v1 }
  0x32   :  { %v69_v14 = vsel %vm63_vm3, %v68_v11, %v57_v10  ;;  %vm52_vm4 = vcmp.lt.f32.partialorder %v32_v3, %v50_v5  ;;  %vm64_vm5 = vcmp.lt.f32.partialorder %v32_v3, %v62_v9  ;;  %vm41_vm6 = vcmp.lt.f32.partialorder %v33_v6, %v38_v2  ;;  %p153_p6 = pnand %p152_p5, %p146_p2 }
  0x33   :  { %73 = vst [vmem:[#allocation8] sm:$0xff] %v69_v14  ;;  %v58_v15 = vsel %vm52_vm4, %v56_v8, %v46_v12  ;;  %v47_v16 = vsel %vm41_vm6, %v44_v4, %v36_v1  ;;  %vm53_vm7 = vcmp.lt.f32.partialorder %v33_v6, %v50_v5  ;;  %vm65_vm8 = vcmp.lt.f32.partialorder %v33_v6, %v62_v9 }
  0x34   :  { %v70_v17 = vsel %vm64_vm5, %v68_v11, %v58_v15  ;;  %v59_v18 = vsel %vm53_vm7, %v56_v8, %v47_v16  ;;  %vm42_vm9 = vcmp.lt.f32.partialorder %v34_v13, %v38_v2  ;;  %vm54_vm10 = vcmp.lt.f32.partialorder %v34_v13, %v50_v5 }
  0x35   :  { %74 = vst [vmem:[#allocation8 + $0x8] sm:$0xff] %v70_v17  ;;  %v71_v19 = vsel %vm65_vm8, %v68_v11, %v59_v18  ;;  %v48_v20 = vsel %vm42_vm9, %v44_v4, %v36_v1  ;;  %vm66_vm11 = vcmp.lt.f32.partialorder %v34_v13, %v62_v9 }
  0x36   :  { %75 = vst [vmem:[#allocation8 + $0x10] sm:$0xff] %v71_v19  ;;  %v60_v21 = vsel %vm54_vm10, %v56_v8, %v48_v20 }
  0x37   :  { %v72_v22 = vsel %vm66_vm11, %v68_v11, %v60_v21 }
  0x38   :  { %76 = vst [vmem:[#allocation8 + $0x18] sm:$0xff] %v72_v22 }
  0x39   :  { %156 = shalt.err (!%p153_p6)
}
  0x3a   :  { %s157_s21 = scalar_lea.hbm %s238_s3, 512 }
  0x3b   :  { %p158_p7 = scmp.ne.s32.totalorder %s238_s3, %s157_s21  ;;  %p161_p8 = scmp.lt.u32.totalorder %s157_s21, %s238_s3 }
  0x3d   :  { %p163_p9 = pnand %p161_p8, %p158_p7 }
  0x3f   :  { %166 = shalt.err (!%p163_p9)
}
  0x40   :  { %86 = dma.vmem_to_hbm [thread:$0]  %s84_s17, 512, %s238_s3, [#allocation7]  }
  0x41   :  { %171 = dma.done.wait [#allocation7], 512  }
  0x42   :  { %172 = vsyncadd [#allocation7], 4294966784 }
  0x43   :  { %90 = vsyncpa [#allocation6], 1 }
  0x44   :  { %91 = vsyncpa [#allocation7], 1 }

</bundles_post_ra>
